<compile_context>
chip_gen: v7x
topology: tpu7x:2x2x1
jax: 0.10.0
libtpu: 0.0.40
codegen_flags: <defaults>
</compile_context>

<pallas_src>
import jax
import jax.numpy as jnp
from jax.experimental import pallas as pl
from jax.experimental.pallas import tpu as pltpu

NEG_SLOPE = 0.01  # PyTorch nn.LeakyReLU default negative_slope

# Logical dims; hidden/output lane-padded to multiples of 128. K (784) unpadded.
IN, HID, OUT = 784, 200, 10
HID_P, OUT_P = 256, 128


def _leaky_relu(x):
    # Identical to where(x > 0, x, a*x) for 0 < a < 1, one fewer VPU op.
    return jnp.maximum(x, NEG_SLOPE * x)


def _round_up(n, m):
    return ((n + m - 1) // m) * m


def _pad_to(a, shape):
    return jnp.pad(a, [(0, s - d) for d, s in zip(a.shape, shape)])


def mlp_kernel(x_ref, w1_ref, b1_ref, w2_ref, b2_ref, w3_ref, b3_ref, o_ref):
    # Layer 1: cast the streamed x tile to bf16 in-kernel (no wrapper HBM pass);
    # (TB,784)bf16 @ (784,256)bf16 -> f32 acc; bias + LeakyReLU in f32 on VPU.
    x = x_ref[...].astype(jnp.bfloat16)
    h = jnp.dot(x, w1_ref[...], preferred_element_type=jnp.float32)
    h = _leaky_relu(h + b1_ref[...])
    # Layer 2: (TB,256) @ (256,256).
    h = jnp.dot(h.astype(jnp.bfloat16), w2_ref[...],
                preferred_element_type=jnp.float32)
    h = _leaky_relu(h + b2_ref[...])
    # Layer 3: (TB,256) @ (256,128) -> lane-dense (TB,128) bf16 store.
    h = jnp.dot(h.astype(jnp.bfloat16), w3_ref[...],
                preferred_element_type=jnp.float32)
    o_ref[...] = _leaky_relu(h + b3_ref[...]).astype(o_ref.dtype)


def mlp_forward(x, w1, b1, w2, b2, w3, b3, *, block_b=1024):
    """x: (B, 784) f32 (or bf16); w_i: (in, out); b_i: (1, out) -> (B, 10) f32."""
    B = x.shape[0]

    # Balanced batch tiling: pick the tile count first, then size each tile as
    # a multiple of 8, so Bp - B stays small.  For mid-size batches force >=2
    # tiles so the "parallel" batch axis can use both v7x TensorCores.
    if B > 64:
        n_tiles = max(pl.cdiv(B, block_b), 2)
    else:
        n_tiles = 1
    tb = _round_up(pl.cdiv(B, n_tiles), 8)
    Bp = _round_up(B, tb)

    # x is NOT padded/cast along features; only batch-padded when unavoidable.
    xp = x if Bp == B else _pad_to(x, (Bp, IN))

    # Parameters: zero-pad hidden/output lanes to 128 multiples, cast MXU
    # operands to bf16 (one-time, tiny).  LeakyReLU(0)=0 keeps padded lanes 0.
    w1p = _pad_to(w1, (IN, HID_P)).astype(jnp.bfloat16)
    b1p = _pad_to(b1, (1, HID_P)).astype(jnp.float32)
    w2p = _pad_to(w2, (HID_P, HID_P)).astype(jnp.bfloat16)
    b2p = _pad_to(b2, (1, HID_P)).astype(jnp.float32)
    w3p = _pad_to(w3, (HID_P, OUT_P)).astype(jnp.bfloat16)
    b3p = _pad_to(b3, (1, OUT_P)).astype(jnp.float32)

    const = lambda i: (0, 0)  # weights/biases: same block every step -> VMEM resident
    grid = (Bp // tb,)

    flops = 2 * Bp * (IN * HID_P + HID_P * HID_P + HID_P * OUT_P)
    bytes_accessed = (
        xp.size * xp.dtype.itemsize                    # streamed x tiles
        + (w1p.size + w2p.size + w3p.size) * 2         # resident bf16 weights
        + (b1p.size + b2p.size + b3p.size) * 4         # f32 biases
        + Bp * OUT_P * 2                               # bf16 output
    )

    out = pl.pallas_call(
        mlp_kernel,
        out_shape=jax.ShapeDtypeStruct((Bp, OUT_P), jnp.bfloat16),
        grid=grid,
        in_specs=[
            pl.BlockSpec((tb, IN), lambda i: (i, 0)),   # x: streamed per tile
            pl.BlockSpec((IN, HID_P), const),
            pl.BlockSpec((1, HID_P), const),
            pl.BlockSpec((HID_P, HID_P), const),
            pl.BlockSpec((1, HID_P), const),
            pl.BlockSpec((HID_P, OUT_P), const),
            pl.BlockSpec((1, OUT_P), const),
        ],
        out_specs=pl.BlockSpec((tb, OUT_P), lambda i: (i, 0)),
        compiler_params=pltpu.CompilerParams(
            dimension_semantics=("parallel",),          # shard batch tiles across TCs (v7x)
            vmem_limit_bytes=32 * 1024 * 1024,          # headroom above v5e's 16 MiB default
        ),
        cost_estimate=pl.CostEstimate(
            flops=flops, transcendentals=0, bytes_accessed=bytes_accessed),
    )(xp, w1p, b1p, w2p, b2p, w3p, b3p)

    return out[:B, :OUT].astype(jnp.float32)


def init_params(key):
    """Deterministic init mirroring nn.Linear's uniform(-1/sqrt(in), 1/sqrt(in))."""
    dims = [(IN, HID), (HID, HID), (HID, OUT)]
    params = []
    for (din, dout) in dims:
        key, kw, kb = jax.random.split(key, 3)
        bound = 1.0 / jnp.sqrt(jnp.float32(din))
        # Stored as (in, out) == transpose of PyTorch's (out, in) weight.
        w = jax.random.uniform(kw, (din, dout), jnp.float32, -bound, bound)
        b = jax.random.uniform(kb, (1, dout), jnp.float32, -bound, bound)
        params += [w, b]
    return params


def _reference(x, w1, b1, w2, b2, w3, b3):
    """Plain-JAX reference using the same bf16-operand / f32-accumulate math."""
    h = x
    for (w, b) in ((w1, b1), (w2, b2), (w3, b3)):
        h = jnp.dot(h.astype(jnp.bfloat16), w.astype(jnp.bfloat16),
                    preferred_element_type=jnp.float32) + b
        h = jnp.where(h > 0, h, NEG_SLOPE * h)
    return h


if __name__ == "__main__":
    key = jax.random.PRNGKey(0)
    key, kx = jax.random.split(key)
    B = 8
    x = jax.random.normal(kx, (B, IN), jnp.float32)

    w1, b1, w2, b2, w3, b3 = init_params(key)

    out = mlp_forward(x, w1, b1, w2, b2, w3, b3)
    out = jax.block_until_ready(out)

    ref = _reference(x, w1, b1, w2, b2, w3, b3)
    assert out.shape == (B, OUT)
    assert jnp.allclose(out, ref, atol=2e-2, rtol=2e-2), (
        float(jnp.max(jnp.abs(out - ref))))

    print("KERNEL_OK")
</pallas_src>

<mosaic_0001>
module attributes {stable_mosaic.version = 11 : i64} {
  func.func @mlp_kernel(%arg0: i32, %arg1: memref<8x784xf32, #tpu.memory_space<vmem>>, %arg2: memref<784x256xbf16, #tpu.memory_space<vmem>>, %arg3: memref<1x256xf32, #tpu.memory_space<vmem>>, %arg4: memref<256x256xbf16, #tpu.memory_space<vmem>>, %arg5: memref<1x256xf32, #tpu.memory_space<vmem>>, %arg6: memref<256x128xbf16, #tpu.memory_space<vmem>>, %arg7: memref<1x128xf32, #tpu.memory_space<vmem>>, %arg8: memref<8x128xbf16, #tpu.memory_space<vmem>>) attributes {dimension_semantics = [#tpu.dimension_semantics<parallel>], iteration_bounds = array<i64: 1>, scalar_prefetch = 0 : i64, scratch_operands = 0 : i64, tpu.core_type = #tpu.core_type<tc>, window_params = [{transform_indices = @transform_0, window_bounds = array<i64: 8, 784>}, {pipeline_mode = #tpu.pipeline_mode<synchronous>, transform_indices = @transform_1, window_bounds = array<i64: 784, 256>}, {pipeline_mode = #tpu.pipeline_mode<synchronous>, transform_indices = @transform_2, window_bounds = array<i64: 1, 256>}, {pipeline_mode = #tpu.pipeline_mode<synchronous>, transform_indices = @transform_3, window_bounds = array<i64: 256, 256>}, {pipeline_mode = #tpu.pipeline_mode<synchronous>, transform_indices = @transform_4, window_bounds = array<i64: 1, 256>}, {pipeline_mode = #tpu.pipeline_mode<synchronous>, transform_indices = @transform_5, window_bounds = array<i64: 256, 128>}, {pipeline_mode = #tpu.pipeline_mode<synchronous>, transform_indices = @transform_6, window_bounds = array<i64: 1, 128>}, {transform_indices = @transform_7, window_bounds = array<i64: 8, 128>}]} {
    %c0 = arith.constant 0 : index
    %c0_0 = arith.constant 0 : index
    %0 = vector.load %arg1[%c0, %c0_0] : memref<8x784xf32, #tpu.memory_space<vmem>>, vector<8x784xf32>
    %1 = arith.truncf %0 : vector<8x784xf32> to vector<8x784xbf16>
    %c0_1 = arith.constant 0 : index
    %c0_2 = arith.constant 0 : index
    %2 = vector.load %arg2[%c0_1, %c0_2] : memref<784x256xbf16, #tpu.memory_space<vmem>>, vector<784x256xbf16>
    %cst = arith.constant dense<0.000000e+00> : vector<8x256xf32>
    %3 = tpu.matmul %1, %2, %cst {dimension_numbers = #tpu.dot_dimension_numbers<[1], [0], [0], [1], [0, 0, 1, 1], [], []>} : vector<8x784xbf16>, vector<784x256xbf16>, vector<8x256xf32> -> vector<8x256xf32>
    %c0_3 = arith.constant 0 : index
    %c0_4 = arith.constant 0 : index
    %4 = vector.load %arg3[%c0_3, %c0_4] : memref<1x256xf32, #tpu.memory_space<vmem>>, vector<1x256xf32>
    %5 = vector.broadcast %4 : vector<1x256xf32> to vector<8x256xf32>
    %6 = arith.addf %3, %5 : vector<8x256xf32>
    %cst_5 = arith.constant 0.00999999977 : f32
    %7 = vector.broadcast %cst_5 : f32 to vector<8x256xf32>
    %8 = arith.mulf %7, %6 : vector<8x256xf32>
    %9 = arith.maximumf %6, %8 : vector<8x256xf32>
    %10 = arith.truncf %9 : vector<8x256xf32> to vector<8x256xbf16>
    %c0_6 = arith.constant 0 : index
    %c0_7 = arith.constant 0 : index
    %11 = vector.load %arg4[%c0_6, %c0_7] : memref<256x256xbf16, #tpu.memory_space<vmem>>, vector<256x256xbf16>
    %cst_8 = arith.constant dense<0.000000e+00> : vector<8x256xf32>
    %12 = tpu.matmul %10, %11, %cst_8 {dimension_numbers = #tpu.dot_dimension_numbers<[1], [0], [0], [1], [0, 0, 1, 1], [], []>} : vector<8x256xbf16>, vector<256x256xbf16>, vector<8x256xf32> -> vector<8x256xf32>
    %c0_9 = arith.constant 0 : index
    %c0_10 = arith.constant 0 : index
    %13 = vector.load %arg5[%c0_9, %c0_10] : memref<1x256xf32, #tpu.memory_space<vmem>>, vector<1x256xf32>
    %14 = vector.broadcast %13 : vector<1x256xf32> to vector<8x256xf32>
    %15 = arith.addf %12, %14 : vector<8x256xf32>
    %cst_11 = arith.constant 0.00999999977 : f32
    %16 = vector.broadcast %cst_11 : f32 to vector<8x256xf32>
    %17 = arith.mulf %16, %15 : vector<8x256xf32>
    %18 = arith.maximumf %15, %17 : vector<8x256xf32>
    %19 = arith.truncf %18 : vector<8x256xf32> to vector<8x256xbf16>
    %c0_12 = arith.constant 0 : index
    %c0_13 = arith.constant 0 : index
    %20 = vector.load %arg6[%c0_12, %c0_13] : memref<256x128xbf16, #tpu.memory_space<vmem>>, vector<256x128xbf16>
    %cst_14 = arith.constant dense<0.000000e+00> : vector<8x128xf32>
    %21 = tpu.matmul %19, %20, %cst_14 {dimension_numbers = #tpu.dot_dimension_numbers<[1], [0], [0], [1], [0, 0, 1, 1], [], []>} : vector<8x256xbf16>, vector<256x128xbf16>, vector<8x128xf32> -> vector<8x128xf32>
    %c0_15 = arith.constant 0 : index
    %c0_16 = arith.constant 0 : index
    %22 = vector.load %arg7[%c0_15, %c0_16] : memref<1x128xf32, #tpu.memory_space<vmem>>, vector<1x128xf32>
    %23 = vector.broadcast %22 : vector<1x128xf32> to vector<8x128xf32>
    %24 = arith.addf %21, %23 : vector<8x128xf32>
    %cst_17 = arith.constant 0.00999999977 : f32
    %25 = vector.broadcast %cst_17 : f32 to vector<8x128xf32>
    %26 = arith.mulf %25, %24 : vector<8x128xf32>
    %27 = arith.maximumf %24, %26 : vector<8x128xf32>
    %28 = arith.truncf %27 : vector<8x128xf32> to vector<8x128xbf16>
    %c0_18 = arith.constant 0 : index
    %c0_19 = arith.constant 0 : index
    %29 = vector.load %arg8[%c0_18, %c0_19] : memref<8x128xbf16, #tpu.memory_space<vmem>>, vector<8x128xbf16>
    tpu.vector_store %arg8[%c0_18, %c0_19], %28 {strides = array<i32>} : memref<8x128xbf16, #tpu.memory_space<vmem>>, vector<8x128xbf16>,
    return
  }
  func.func @transform_0(%arg0: i32) -> (i32, i32) {
    %c0_i32 = arith.constant 0 : i32
    %c0_i32_0 = arith.constant 0 : i32
    return %arg0, %c0_i32 : i32, i32
  }
  func.func @transform_1(%arg0: i32) -> (i32, i32) {
    %c0_i32 = arith.constant 0 : i32
    %c0_i32_0 = arith.constant 0 : i32
    %c0_i32_1 = arith.constant 0 : i32
    return %c0_i32, %c0_i32_0 : i32, i32
  }
  func.func @transform_2(%arg0: i32) -> (i32, i32) {
    %c0_i32 = arith.constant 0 : i32
    %c0_i32_0 = arith.constant 0 : i32
    %c0_i32_1 = arith.constant 0 : i32
    return %c0_i32, %c0_i32_0 : i32, i32
  }
  func.func @transform_3(%arg0: i32) -> (i32, i32) {
    %c0_i32 = arith.constant 0 : i32
    %c0_i32_0 = arith.constant 0 : i32
    %c0_i32_1 = arith.constant 0 : i32
    return %c0_i32, %c0_i32_0 : i32, i32
  }
  func.func @transform_4(%arg0: i32) -> (i32, i32) {
    %c0_i32 = arith.constant 0 : i32
    %c0_i32_0 = arith.constant 0 : i32
    %c0_i32_1 = arith.constant 0 : i32
    return %c0_i32, %c0_i32_0 : i32, i32
  }
  func.func @transform_5(%arg0: i32) -> (i32, i32) {
    %c0_i32 = arith.constant 0 : i32
    %c0_i32_0 = arith.constant 0 : i32
    %c0_i32_1 = arith.constant 0 : i32
    return %c0_i32, %c0_i32_0 : i32, i32
  }
  func.func @transform_6(%arg0: i32) -> (i32, i32) {
    %c0_i32 = arith.constant 0 : i32
    %c0_i32_0 = arith.constant 0 : i32
    %c0_i32_1 = arith.constant 0 : i32
    return %c0_i32, %c0_i32_0 : i32, i32
  }
  func.func @transform_7(%arg0: i32) -> (i32, i32) {
    %c0_i32 = arith.constant 0 : i32
    %c0_i32_0 = arith.constant 0 : i32
    return %arg0, %c0_i32 : i32, i32
  }
}

</mosaic_0001>

<bundles_post_ra>
// kernel: tpu_custom_call.1
= control target key start
LH: loop header
LB: loop body
LE: loop exit
PB: predicated region body
PF: predicated region fallthrough
CT: control target
= control target key end

     0   :  { %12 = vsyncpa [#allocation3], 0  ;;  %s1962_s0 = inlined_call_operand.hbm [shape: f32[8,784], index: 0, kind: input, shape index: {}]   ;;  %s1963_s1 = inlined_call_operand.hbm [shape: bf16[784,256], index: 1, kind: input, shape index: {}]   ;;  %s1964_s2 = inlined_call_operand.vmem [shape: f32[1,256], index: 2, kind: input, shape index: {}]   ;;  %s1965_s3 = inlined_call_operand.hbm [shape: bf16[256,256], index: 3, kind: input, shape index: {}]   ;;  %s1966_s4 = inlined_call_operand.vmem [shape: f32[1,256], index: 4, kind: input, shape index: {}]   ;;  %s1967_s5 = inlined_call_operand.hbm [shape: bf16[256,128], index: 5, kind: input, shape index: {}]   ;;  %s1968_s6 = inlined_call_operand.vmem [shape: f32[1,128], index: 6, kind: input, shape index: {}]   ;;  %s1969_s7 = inlined_call_operand.hbm [shape: bf16[8,128], index: 7, kind: output, shape index: {}]  }
   0x1   :  { %13 = vsyncpa [#allocation6], 0 }
   0x2   :  { %14 = vsyncpa [#allocation9], 0 }
   0x3   :  { %15 = vsyncpa [#allocation4], 0  ;;  %s1837_s24 = smov [#allocation5]   ;;  %s1719_s28 = scalar_lea.hbm %s1963_s1, 12544 }
   0x4   :  { %s31_s25 = sshll.u32 %s1837_s24, 4  ;;  %p1720_p0 = scmp.ne.s32.totalorder %s1963_s1, %s1719_s28  ;;  %s32_s25 = int_to_ptr.vmem [resolvable:$true] %s31_s25 }
   0x5   :  { %p1723_p1 = scmp.lt.u32.totalorder %s1719_s28, %s1963_s1 }
   0x7   :  { %p1725_p2 = pnand %p1723_p1, %p1720_p0 }
   0x9   :  { %1728 = shalt.err (!%p1725_p2)
}
   0xa   :  { %s1729_s10 = scalar_lea.vmem %s32_s25, 12544  ;;  %p1734_p4 = scmp.lt.s32.totalorder %s32_s25, %s32_s25 }
   0xb   :  { %p1730_p3 = scmp.ne.s32.totalorder %s32_s25, %s1729_s10  ;;  %p1735_p5 = scmp.lt.s32.totalorder %s1729_s10, %s1729_s10 }
   0xd   :  { %p1736_p6 = por %p1735_p5, %p1734_p4 }
   0xf   :  { %p1737_p7 = pnand %p1736_p6, %p1730_p3 }
  0x11   :  { %1740 = shalt.err (!%p1737_p7)
}
  0x12   :  { %s1838_s11 = smov 128   ;;  %s1839_s12 = smov 8  }
  0x13   :  { %37 = dma.hbm_to_vmem [thread:$0]  %s1963_s1, 12544, %s32_s25, [#allocation6], %s1838_s11, %s1838_s11, %s1839_s12  }
  0x14   :  { %s1840_s15 = smov [#allocation2]   ;;  %s1841_s17 = smov [#allocation7]  }
  0x15   :  { %s22_s16 = sshll.u32 %s1840_s15, 4  ;;  %s45_s18 = sshll.u32 %s1841_s17, 4  ;;  %s23_s16 = int_to_ptr.vmem [resolvable:$true] %s22_s16  ;;  %s46_s18 = int_to_ptr.vmem [resolvable:$true] %s45_s18 }
  0x16   :  { %s1741_s21 = scalar_lea.hbm %s1962_s0, 896 }
  0x17   :  { %p1742_p8 = scmp.ne.s32.totalorder %s1962_s0, %s1741_s21  ;;  %p1745_p9 = scmp.lt.u32.totalorder %s1741_s21, %s1962_s0 }
  0x19   :  { %p1747_p10 = pnand %p1745_p9, %p1742_p8 }
  0x1b   :  { %1750 = shalt.err (!%p1747_p10)
}
  0x1c   :  { %s1751_s1 = scalar_lea.vmem %s23_s16, 896  ;;  %p1756_p12 = scmp.lt.s32.totalorder %s23_s16, %s23_s16 }
  0x1d   :  { %p1752_p11 = scmp.ne.s32.totalorder %s23_s16, %s1751_s1  ;;  %p1757_p13 = scmp.lt.s32.totalorder %s1751_s1, %s1751_s1 }
  0x1f   :  { %p1758_p0 = por %p1757_p13, %p1756_p12 }
  0x21   :  { %p1759_p1 = pnand %p1758_p0, %p1752_p11 }
  0x23   :  { %1762 = shalt.err (!%p1759_p1)
}
  0x24   :  { %25 = dma.hbm_to_vmem [thread:$0]  %s1962_s0, 896, %s23_s16, [#allocation3]  }
  0x25   :  { %s1763_s30 = scalar_lea.hbm %s1965_s3, 4096 }
  0x26   :  { %p1764_p2 = scmp.ne.s32.totalorder %s1965_s3, %s1763_s30  ;;  %p1767_p3 = scmp.lt.u32.totalorder %s1763_s30, %s1965_s3 }
  0x28   :  { %p1769_p4 = pnand %p1767_p3, %p1764_p2 }
  0x2a   :  { %1772 = shalt.err (!%p1769_p4)
}
  0x2b   :  { %s1773_s14 = scalar_lea.vmem %s46_s18, 4096  ;;  %p1778_p6 = scmp.lt.s32.totalorder %s46_s18, %s46_s18 }
  0x2c   :  { %p1774_p5 = scmp.ne.s32.totalorder %s46_s18, %s1773_s14  ;;  %p1779_p7 = scmp.lt.s32.totalorder %s1773_s14, %s1773_s14 }
  0x2e   :  { %p1780_p8 = por %p1779_p7, %p1778_p6 }
  0x30   :  { %p1781_p9 = pnand %p1780_p8, %p1774_p5 }
  0x32   :  { %1784 = shalt.err (!%p1781_p9)
}
  0x33   :  { %51 = dma.hbm_to_vmem [thread:$0]  %s1965_s3, 4096, %s46_s18, [#allocation6], %s1838_s11, %s1838_s11, %s1839_s12  }
  0x34   :  { %s1842_s16 = smov [#allocation8]   ;;  %s1785_s21 = scalar_lea.hbm %s1967_s5, 2048 }
  0x35   :  { %s59_s17 = sshll.u32 %s1842_s16, 4  ;;  %p1786_p10 = scmp.ne.s32.totalorder %s1967_s5, %s1785_s21  ;;  %s60_s17 = int_to_ptr.vmem [resolvable:$true] %s59_s17 }
  0x36   :  { %p1789_p11 = scmp.lt.u32.totalorder %s1785_s21, %s1967_s5 }
  0x38   :  { %p1791_p12 = pnand %p1789_p11, %p1786_p10 }
  0x3a   :  { %1794 = shalt.err (!%p1791_p12)
}
  0x3b   :  { %s1795_s1 = scalar_lea.vmem %s60_s17, 2048  ;;  %p1800_p0 = scmp.lt.s32.totalorder %s60_s17, %s60_s17 }
  0x3c   :  { %p1796_p13 = scmp.ne.s32.totalorder %s60_s17, %s1795_s1  ;;  %p1801_p1 = scmp.lt.s32.totalorder %s1795_s1, %s1795_s1 }
  0x3e   :  { %p1802_p2 = por %p1801_p1, %p1800_p0 }
  0x40   :  { %p1803_p3 = pnand %p1802_p2, %p1796_p13 }
  0x42   :  { %1806 = shalt.err (!%p1803_p3)
}
  0x43   :  { %s1843_s3 = smov 64   ;;  %s1844_s11 = smov 4  }
  0x44   :  { %65 = dma.hbm_to_vmem [thread:$0]  %s1967_s5, 2048, %s60_s17, [#allocation9], %s1843_s3, %s1843_s3, %s1844_s11  }
  0x45   :  { %1829 = dma.done.wait [#allocation3], 896  }
  0x46   :  { %1830 = vsyncadd [#allocation3], 4294966400 }
  0x47   :  { %1831 = dma.done.wait [#allocation6], 16640  }
  0x48   :  { %1832 = vsyncadd [#allocation6], 4294950656 }
  0x49   :  { %1833 = dma.done.wait [#allocation9], 2048  }
  0x4a   :  { %1834 = vsyncadd [#allocation9], 4294965248  ;;  %v1508_v0 = vld [vmem:[#allocation5 + $0x104] ss:$8 sps:$4 sm:$0xff]   ;;  %v1510_v1 = vld [vmem:[#allocation5 + $0x100] ss:$8 sps:$4 sm:$0xff]  }
  0x4b   :  { %740 = vmatprep.subr.bf16.mxu0 %v1508_v0  ;;  %v1511_v2 = vld [vmem:[#allocation5 + $0x114] ss:$8 sps:$4 sm:$0xff]   ;;  %v1513_v3 = vld [vmem:[#allocation5 + $0x110] ss:$8 sps:$4 sm:$0xff]   ;;  %v1514_v4 = vld [vmem:[#allocation5 + $0x124] ss:$8 sps:$4 sm:$0xff]  }
  0x4c   :  { %741 = vmatpush1.bf16.msra.mxu0 %v1510_v1  ;;  %v1516_v5 = vld [vmem:[#allocation5 + $0x120] ss:$8 sps:$4 sm:$0xff]   ;;  %v1517_v6 = vld [vmem:[#allocation5 + $0x134] ss:$8 sps:$4 sm:$0xff]   ;;  %v1519_v7 = vld [vmem:[#allocation5 + $0x130] ss:$8 sps:$4 sm:$0xff]  }
  0x4d   :  { %742 = vmatprep.subr.bf16.mxu0 %v1511_v2  ;;  %v1520_v8 = vld [vmem:[#allocation5 + $0x144] ss:$8 sps:$4 sm:$0xff]   ;;  %v1522_v9 = vld [vmem:[#allocation5 + $0x140] ss:$8 sps:$4 sm:$0xff]   ;;  %v1523_v10 = vld [vmem:[#allocation5 + $0x154] ss:$8 sps:$4 sm:$0xff]  }
  0x4e   :  { %v1525_v11 = vld [vmem:[#allocation5 + $0x150] ss:$8 sps:$4 sm:$0xff]   ;;  %v1526_v12 = vld [vmem:[#allocation5 + $0x164] ss:$8 sps:$4 sm:$0xff]   ;;  %v1528_v15 = vld [vmem:[#allocation5 + $0x160] ss:$8 sps:$4 sm:$0xff]  }
  0x4f   :  { %v84_v13 = vld [vmem:[#allocation2 + $0x18] sm:$0xff]  ;;  %v1529_v16 = vld [vmem:[#allocation5 + $0x174] ss:$8 sps:$4 sm:$0xff]   ;;  %v1531_v18 = vld [vmem:[#allocation5 + $0x170] ss:$8 sps:$4 sm:$0xff]   ;;  %vm695_vm0 = vcmask 130048  }
  0x50   :  { %743 = vmatpush1.bf16.msra.mxu0 %v1513_v3  ;;  %v91_v14 = vpack.c.bf16 %v84_v13, %v84_v13  ;;  %v1562_v17 = vld [vmem:[#allocation5 + $0x4] ss:$8 sps:$4 sm:$0xff]   ;;  %v1567_v20 = vld [vmem:[#allocation5] ss:$8 sps:$4 sm:$0xff]   ;;  %v1568_v21 = vld [vmem:[#allocation5 + $0x14] ss:$8 sps:$4 sm:$0xff]  }
  0x51   :  { %744 = vmatprep.subr.bf16.mxu0 %v1514_v4  ;;  %v1532_v19 = vld [vmem:[#allocation5 + $0x184] ss:$8 sps:$4 sm:$0xff]   ;;  %699 = vmatprep.subr.bf16.mxu1 %v1562_v17  ;;  %v1573_v22 = vld [vmem:[#allocation5 + $0x10] ss:$8 sps:$4 sm:$0xff]   ;;  %v1534_v24 = vld [vmem:[#allocation5 + $0x180] ss:$8 sps:$4 sm:$0xff]  }
  0x52   :  { %772 = vmatprep.mubr.bf16.mxu0 %v91_v14  ;;  %700 = vmatpush1.bf16.msra.mxu1 %v1567_v20  ;;  %v1574_v23 = vld [vmem:[#allocation5 + $0x24] ss:$8 sps:$4 sm:$0xff]   ;;  %v1535_v25 = vld [vmem:[#allocation5 + $0x194] ss:$8 sps:$4 sm:$0xff]   ;;  %v1579_v26 = vld [vmem:[#allocation5 + $0x20] ss:$8 sps:$4 sm:$0xff]  }
  0x53   :  { %701 = vmatprep.subr.bf16.mxu1 %v1568_v21  ;;  %v1580_v27 = vld [vmem:[#allocation5 + $0x34] ss:$8 sps:$4 sm:$0xff]   ;;  %v1537_v28 = vld [vmem:[#allocation5 + $0x190] ss:$8 sps:$4 sm:$0xff]   ;;  %v1538_v29 = vld [vmem:[#allocation5 + $0x1a4] ss:$8 sps:$4 sm:$0xff]  }
  0x54   :  { %745 = vmatpush1.bf16.msra.mxu0 %v1516_v5  ;;  %v1585_v30 = vld [vmem:[#allocation5 + $0x30] ss:$8 sps:$4 sm:$0xff]   ;;  %v1586_v31 = vld [vmem:[#allocation5 + $0x44] ss:$8 sps:$4 sm:$0xff]   ;;  %v1540_v32 = vld [vmem:[#allocation5 + $0x1a0] ss:$8 sps:$4 sm:$0xff]  }
  0x55   :  { %746 = vmatprep.subr.bf16.mxu0 %v1517_v6  ;;  %v1541_v33 = vld [vmem:[#allocation5 + $0x1b4] ss:$8 sps:$4 sm:$0xff]   ;;  %v1591_v34 = vld [vmem:[#allocation5 + $0x40] ss:$8 sps:$4 sm:$0xff]   ;;  %v1543_v36 = vld [vmem:[#allocation5 + $0x1b0] ss:$8 sps:$4 sm:$0xff]  }
  0x56   :  { %702 = vmatpush1.bf16.msra.mxu1 %v1573_v22  ;;  %v1592_v35 = vld [vmem:[#allocation5 + $0x54] ss:$8 sps:$4 sm:$0xff]   ;;  %v1544_v37 = vld [vmem:[#allocation5 + $0x1c4] ss:$8 sps:$4 sm:$0xff]   ;;  %v1597_v38 = vld [vmem:[#allocation5 + $0x50] ss:$8 sps:$4 sm:$0xff]  }
  0x57   :  { %703 = vmatprep.subr.bf16.mxu1 %v1574_v23  ;;  %v1598_v39 = vld [vmem:[#allocation5 + $0x64] ss:$8 sps:$4 sm:$0xff]   ;;  %v1546_v40 = vld [vmem:[#allocation5 + $0x1c0] ss:$8 sps:$4 sm:$0xff]   ;;  %v1547_v41 = vld [vmem:[#allocation5 + $0x1d4] ss:$8 sps:$4 sm:$0xff]  }
  0x58   :  { %747 = vmatpush1.bf16.msra.mxu0 %v1519_v7  ;;  %v1603_v42 = vld [vmem:[#allocation5 + $0x60] ss:$8 sps:$4 sm:$0xff]   ;;  %v1604_v43 = vld [vmem:[#allocation5 + $0x74] ss:$8 sps:$4 sm:$0xff]   ;;  %v1549_v44 = vld [vmem:[#allocation5 + $0x1d0] ss:$8 sps:$4 sm:$0xff]  }
  0x59   :  { %748 = vmatprep.subr.bf16.mxu0 %v1520_v8  ;;  %v1550_v45 = vld [vmem:[#allocation5 + $0x1e4] ss:$8 sps:$4 sm:$0xff]   ;;  %v1609_v46 = vld [vmem:[#allocation5 + $0x70] ss:$8 sps:$4 sm:$0xff]   ;;  %v1552_v48 = vld [vmem:[#allocation5 + $0x1e0] ss:$8 sps:$4 sm:$0xff]  }
  0x5a   :  { %704 = vmatpush1.bf16.msra.mxu1 %v1579_v26  ;;  %v1610_v47 = vld [vmem:[#allocation5 + $0x84] ss:$8 sps:$4 sm:$0xff]   ;;  %v1553_v49 = vld [vmem:[#allocation5 + $0x1f4] ss:$8 sps:$4 sm:$0xff]   ;;  %v1615_v50 = vld [vmem:[#allocation5 + $0x80] ss:$8 sps:$4 sm:$0xff]  }
  0x5b   :  { %705 = vmatprep.subr.bf16.mxu1 %v1580_v27  ;;  %v1555_v51 = vld [vmem:[#allocation5 + $0x1f0] ss:$8 sps:$4 sm:$0xff]   ;;  %v1616_v52 = vld [vmem:[#allocation5 + $0x94] ss:$8 sps:$4 sm:$0xff]   ;;  %v1558_v54 = vld [vmem:[#allocation5 + $0x204] ss:$8 sps:$4 sm:$0xff]  }
  0x5c   :  { %749 = vmatpush1.bf16.msra.mxu0 %v1522_v9  ;;  %v83_v53 = vld [vmem:[#allocation2 + $0x10] sm:$0xff]  ;;  %v1622_v56 = vld [vmem:[#allocation5 + $0xa4] ss:$8 sps:$4 sm:$0xff]   ;;  %v86_v58 = vld [vmem:[#allocation2 + $0x28] sm:$0xff] }
  0x5d   :  { %750 = vmatprep.subr.bf16.mxu0 %v1523_v10  ;;  %v1621_v55 = vld [vmem:[#allocation5 + $0x90] ss:$8 sps:$4 sm:$0xff]   ;;  %v90_v57 = vpack.c.bf16 %v83_v53, %v83_v53  ;;  %v1556_v59 = vld [vmem:[#allocation5 + $0x200] ss:$8 sps:$4 sm:$0xff]   ;;  %v93_v60 = vpack.c.bf16 %v86_v58, %v86_v58  ;;  %v1561_v61 = vld [vmem:[#allocation5 + $0x214] ss:$8 sps:$4 sm:$0xff]  }
  0x5e   :  { %706 = vmatpush1.bf16.msra.mxu1 %v1585_v30  ;;  %v1627_v62 = vld [vmem:[#allocation5 + $0xa0] ss:$8 sps:$4 sm:$0xff]   ;;  %v1628_v63 = vld [vmem:[#allocation5 + $0xb4] ss:$8 sps:$4 sm:$0xff]   ;;  %v1559_v1 = vld [vmem:[#allocation5 + $0x210] ss:$8 sps:$4 sm:$0xff]  }
  0x5f   :  { %707 = vmatprep.subr.bf16.mxu1 %v1586_v31  ;;  %v82_v0 = vld [vmem:[#allocation2 + $0x8] sm:$0xff]  ;;  %v1566_v3 = vld [vmem:[#allocation5 + $0x224] ss:$8 sps:$4 sm:$0xff]   ;;  %v1564_v6 = vld [vmem:[#allocation5 + $0x220] ss:$8 sps:$4 sm:$0xff]  }
  0x60   :  { %751 = vmatpush1.bf16.msra.mxu0 %v1525_v11  ;;  %v89_v2 = vpack.c.bf16 %v82_v0, %v82_v0  ;;  %v1633_v4 = vld [vmem:[#allocation5 + $0xb0] ss:$8 sps:$4 sm:$0xff]   ;;  %v1634_v5 = vld [vmem:[#allocation5 + $0xc4] ss:$8 sps:$4 sm:$0xff]   ;;  %v1572_v7 = vld [vmem:[#allocation5 + $0x234] ss:$8 sps:$4 sm:$0xff]  }
  0x61   :  { %752 = vmatprep.subr.bf16.mxu0 %v1526_v12  ;;  %v1639_v8 = vld [vmem:[#allocation5 + $0xc0] ss:$8 sps:$4 sm:$0xff]   ;;  %v1640_v9 = vld [vmem:[#allocation5 + $0xd4] ss:$8 sps:$4 sm:$0xff]   ;;  %v1570_v10 = vld [vmem:[#allocation5 + $0x230] ss:$8 sps:$4 sm:$0xff]  }
  0x62   :  { %708 = vmatpush1.bf16.msra.mxu1 %v1591_v34  ;;  %731 = vmatprep.mubr.bf16.mxu1 %v89_v2  ;;  %v1578_v11 = vld [vmem:[#allocation5 + $0x244] ss:$8 sps:$4 sm:$0xff]   ;;  %v1645_v12 = vld [vmem:[#allocation5 + $0xd0] ss:$8 sps:$4 sm:$0xff]   ;;  %v1576_v14 = vld [vmem:[#allocation5 + $0x240] ss:$8 sps:$4 sm:$0xff]  }
  0x63   :  { %709 = vmatprep.subr.bf16.mxu1 %v1592_v35  ;;  %v1646_v13 = vld [vmem:[#allocation5 + $0xe4] ss:$8 sps:$4 sm:$0xff]   ;;  %v1652_v17 = vld [vmem:[#allocation5 + $0xf4] ss:$8 sps:$4 sm:$0xff]   ;;  %v1654_v20 = vld [vmem:[#allocation5 + $0xf0] ss:$8 sps:$4 sm:$0xff]  }
  0x64   :  { %753 = vmatpush1.bf16.msra.mxu0 %v1528_v15  ;;  %v1584_v15 = vld [vmem:[#allocation5 + $0x254] ss:$8 sps:$4 sm:$0xff]   ;;  %v81_v21 = vld [vmem:[#allocation2] sm:$0xff]  ;;  %v1661_v34 = vld [vmem:[#allocation7 + $0x20] ss:$8 sps:$4 sm:$0xff]  }
  0x65   :  { %754 = vmatprep.subr.bf16.mxu0 %v1529_v16  ;;  %v1651_v16 = vld [vmem:[#allocation5 + $0xe0] ss:$8 sps:$4 sm:$0xff]   ;;  %v1657_v23 = vld [vmem:[#allocation7 + $0x4] ss:$8 sps:$4 sm:$0xff]   ;;  %v88_v26 = vpack.c.bf16 %v81_v21, %v81_v21  ;;  %v1660_v27 = vld [vmem:[#allocation7 + $0x14] ss:$8 sps:$4 sm:$0xff]  }
  0x66   :  { %710 = vmatpush1.bf16.msra.mxu1 %v1597_v38  ;;  %v1588_v22 = vld [vmem:[#allocation5 + $0x260] ss:$8 sps:$4 sm:$0xff]   ;;  %v1663_v31 = vld [vmem:[#allocation7 + $0x24] ss:$8 sps:$4 sm:$0xff]   ;;  %v1666_v35 = vld [vmem:[#allocation7 + $0x34] ss:$8 sps:$4 sm:$0xff]  }
  0x67   :  { %711 = vmatprep.subr.bf16.mxu1 %v1598_v39  ;;  %v1658_v30 = vld [vmem:[#allocation7 + $0x10] ss:$8 sps:$4 sm:$0xff]   ;;  %v1669_v39 = vld [vmem:[#allocation7 + $0x44] ss:$8 sps:$4 sm:$0xff]   ;;  %v1638_v53 = vld [vmem:[#allocation5 + $0x2e4] ss:$8 sps:$4 sm:$0xff]  }
  0x68   :  { %755 = vmatpush1.bf16.msra.mxu0 %v1531_v18  ;;  %v1582_v18 = vld [vmem:[#allocation5 + $0x250] ss:$8 sps:$4 sm:$0xff]   ;;  %v1664_v38 = vld [vmem:[#allocation7 + $0x30] ss:$8 sps:$4 sm:$0xff]  }
  0x69   :  { %756 = vmatprep.subr.bf16.mxu0 %v1532_v19  ;;  %v1590_v19 = vld [vmem:[#allocation5 + $0x264] ss:$8 sps:$4 sm:$0xff]   ;;  %v1679_v58 = vld [vmem:[#allocation7 + $0x80] ss:$8 sps:$4 sm:$0xff]   ;;  %v1648_v2 = vld [vmem:[#allocation5 + $0x300] ss:$8 sps:$4 sm:$0xff]  }
  0x6a   :  { %712 = vmatpush1.bf16.msra.mxu1 %v1603_v42  ;;  %v1667_v42 = vld [vmem:[#allocation7 + $0x40] ss:$8 sps:$4 sm:$0xff]  }
  0x6b   :  { %713 = vmatprep.subr.bf16.mxu1 %v1604_v43  ;;  %v1672_v43 = vld [vmem:[#allocation7 + $0x54] ss:$8 sps:$4 sm:$0xff]  }
  0x6c   :  { %757 = vmatpush1.bf16.msra.mxu0 %v1534_v24  ;;  %v1596_v24 = vld [vmem:[#allocation5 + $0x274] ss:$8 sps:$4 sm:$0xff]  }
  0x6d   :  { %758 = vmatprep.subr.bf16.mxu0 %v1535_v25  ;;  %v1655_v25 = vld [vmem:[#allocation7] ss:$8 sps:$4 sm:$0xff]  }
  0x6e   :  { %714 = vmatpush1.bf16.msra.mxu1 %v1609_v46  ;;  %v1670_v46 = vld [vmem:[#allocation7 + $0x50] ss:$8 sps:$4 sm:$0xff]  }
  0x6f   :  { %715 = vmatprep.subr.bf16.mxu1 %v1610_v47  ;;  %v1675_v47 = vld [vmem:[#allocation7 + $0x64] ss:$8 sps:$4 sm:$0xff]  }
  0x70   :  { %759 = vmatpush1.bf16.msra.mxu0 %v1537_v28  ;;  %v1594_v28 = vld [vmem:[#allocation5 + $0x270] ss:$8 sps:$4 sm:$0xff]  }
  0x71   :  { %760 = vmatprep.subr.bf16.mxu0 %v1538_v29  ;;  %v1602_v29 = vld [vmem:[#allocation5 + $0x284] ss:$8 sps:$4 sm:$0xff]  }
  0x72   :  { %716 = vmatpush1.bf16.msra.mxu1 %v1615_v50  ;;  %v1673_v50 = vld [vmem:[#allocation7 + $0x60] ss:$8 sps:$4 sm:$0xff]  }
  0x73   :  { %717 = vmatprep.subr.bf16.mxu1 %v1616_v52  ;;  %v1630_v52 = vld [vmem:[#allocation5 + $0x2d0] ss:$8 sps:$4 sm:$0xff]  }
  0x74   :  { %761 = vmatpush1.bf16.msra.mxu0 %v1540_v32  ;;  %v1600_v32 = vld [vmem:[#allocation5 + $0x280] ss:$8 sps:$4 sm:$0xff]  }
  0x75   :  { %762 = vmatprep.subr.bf16.mxu0 %v1541_v33  ;;  %v1608_v33 = vld [vmem:[#allocation5 + $0x294] ss:$8 sps:$4 sm:$0xff]  }
  0x76   :  { %718 = vmatpush1.bf16.msra.mxu1 %v1621_v55  ;;  %v1681_v55 = vld [vmem:[#allocation7 + $0x84] ss:$8 sps:$4 sm:$0xff]  }
  0x77   :  { %719 = vmatprep.subr.bf16.mxu1 %v1622_v56  ;;  %v1636_v56 = vld [vmem:[#allocation5 + $0x2e0] ss:$8 sps:$4 sm:$0xff]  }
  0x78   :  { %763 = vmatpush1.bf16.msra.mxu0 %v1543_v36  ;;  %v1606_v36 = vld [vmem:[#allocation5 + $0x290] ss:$8 sps:$4 sm:$0xff]  }
  0x79   :  { %764 = vmatprep.subr.bf16.mxu0 %v1544_v37  ;;  %v1614_v37 = vld [vmem:[#allocation5 + $0x2a4] ss:$8 sps:$4 sm:$0xff]  }
  0x7a   :  { %720 = vmatpush1.bf16.msra.mxu1 %v1627_v62  ;;  %v1650_v62 = vld [vmem:[#allocation5 + $0x304] ss:$8 sps:$4 sm:$0xff]  }
  0x7b   :  { %721 = vmatprep.subr.bf16.mxu1 %v1628_v63  ;;  %v1682_v63 = vld [vmem:[#allocation7 + $0x90] ss:$8 sps:$4 sm:$0xff]  }
  0x7c   :  { %765 = vmatpush1.bf16.msra.mxu0 %v1546_v40  ;;  %v1612_v40 = vld [vmem:[#allocation5 + $0x2a0] ss:$8 sps:$4 sm:$0xff]  }
  0x7d   :  { %766 = vmatprep.subr.bf16.mxu0 %v1547_v41  ;;  %v1620_v41 = vld [vmem:[#allocation5 + $0x2b4] ss:$8 sps:$4 sm:$0xff]  }
  0x7e   :  { %722 = vmatpush1.bf16.msra.mxu1 %v1633_v4  ;;  %v1690_v4 = vld [vmem:[#allocation7 + $0xb4] ss:$8 sps:$4 sm:$0xff]  }
  0x7f   :  { %723 = vmatprep.subr.bf16.mxu1 %v1634_v5  ;;  %v1845_v5 = vmov 0  }
  0x80   :  { %767 = vmatpush1.bf16.msra.mxu0 %v1549_v44  ;;  %v1618_v44 = vld [vmem:[#allocation5 + $0x2b0] ss:$8 sps:$4 sm:$0xff]  }
  0x81   :  { %768 = vmatprep.subr.bf16.mxu0 %v1550_v45  ;;  %v1626_v45 = vld [vmem:[#allocation5 + $0x2c4] ss:$8 sps:$4 sm:$0xff]  }
  0x82   :  { %724 = vmatpush1.bf16.msra.mxu1 %v1639_v8  ;;  %v87_v8 = vld [vmem:[#allocation2 + $0x30] sm:$0xff] }
  0x83   :  { %725 = vmatprep.subr.bf16.mxu1 %v1640_v9  ;;  %v1691_v9 = vld [vmem:[#allocation7 + $0xc0] ss:$8 sps:$4 sm:$0xff]  }
  0x84   :  { %769 = vmatpush1.bf16.msra.mxu0 %v1552_v48  ;;  %v1624_v48 = vld [vmem:[#allocation5 + $0x2c0] ss:$8 sps:$4 sm:$0xff]  }
  0x85   :  { %770 = vmatprep.subr.bf16.mxu0 %v1553_v49  ;;  %v1632_v49 = vld [vmem:[#allocation5 + $0x2d4] ss:$8 sps:$4 sm:$0xff]  }
  0x86   :  { %726 = vmatpush1.bf16.msra.mxu1 %v1645_v12  ;;  %v1696_v12 = vld [vmem:[#allocation7 + $0xd4] ss:$8 sps:$4 sm:$0xff]  }
  0x87   :  { %727 = vmatprep.subr.bf16.mxu1 %v1646_v13  ;;  %v1699_v13 = vld [vmem:[#allocation7 + $0xe4] ss:$8 sps:$4 sm:$0xff]  }
  0x88   :  { %771 = vmatpush1.bf16.msra.mxu0 %v1555_v51  ;;  %v1678_v51 = vld [vmem:[#allocation7 + $0x74] ss:$8 sps:$4 sm:$0xff]  }
  0x89   :  { %781 = vmatprep.subr.bf16.mxu0 %v1558_v54  ;;  %v1676_v54 = vld [vmem:[#allocation7 + $0x70] ss:$8 sps:$4 sm:$0xff]  }
  0x8a   :  { %728 = vmatpush1.bf16.msra.mxu1 %v1651_v16  ;;  %v1700_v16 = vld [vmem:[#allocation7 + $0xf0] ss:$8 sps:$4 sm:$0xff]  }
  0x8b   :  { %773 = vmatmul.mubr.bf16.vlgmr.msra.gmra.mrb[0].mxu0 %v90_v57  ;;  %729 = vmatprep.subr.bf16.mxu1 %v1652_v17  ;;  %v1644_v57 = vld [vmem:[#allocation5 + $0x2f4] ss:$8 sps:$4 sm:$0xff]  }
  0x8c   :  { %782 = vmatpush1.bf16.msra.mxu0 %v1556_v59  ;;  %813 = vmatprep.mubr.bf16.mxu0 %v93_v60  ;;  %v1684_v59 = vld [vmem:[#allocation7 + $0x94] ss:$8 sps:$4 sm:$0xff]   ;;  %v1642_v60 = vld [vmem:[#allocation5 + $0x2f0] ss:$8 sps:$4 sm:$0xff]  }
  0x8d   :  { %783 = vmatprep.subr.bf16.mxu0 %v1561_v61  ;;  %v85_v61 = vld [vmem:[#allocation2 + $0x20] sm:$0xff]  ;;  %v1703_v17 = vld [vmem:[#allocation8 + $0x40] sm:$0xff]  }
  0x8e   :  { %730 = vmatpush1.bf16.msra.mxu1 %v1654_v20  ;;  %v92_v0 = vpack.c.bf16 %v85_v61, %v85_v61 }
  0x8f   :  { %1073 = vmatprep.subr.bf16.mxu1 %v1657_v23 }
  0x90   :  { %784 = vmatpush1.bf16.msra.mxu0 %v1559_v1  ;;  %v1687_v1 = vld [vmem:[#allocation7 + $0xa4] ss:$8 sps:$4 sm:$0xff]  }
  0x91   :  { %785 = vmatprep.subr.bf16.mxu0 %v1566_v3  ;;  %732 = vmatmul.mubr.bf16.vlgmr.msra.gmra.mrb[0].mxu1 %v88_v26  ;;  %v1685_v3 = vld [vmem:[#allocation7 + $0xa0] ss:$8 sps:$4 sm:$0xff]  }
  0x92   :  { %1074 = vmatpush1.bf16.msra.mxu1 %v1655_v25  ;;  %v193_v25 = vld [vmem:[%s1964_s2] sm:$0x3] }
  0x93   :  { %1075 = vmatprep.subr.bf16.mxu1 %v1660_v27 }
  0x94   :  { %786 = vmatpush1.bf16.msra.mxu0 %v1564_v6  ;;  %v1688_v6 = vld [vmem:[#allocation7 + $0xb0] ss:$8 sps:$4 sm:$0xff]  }
  0x95   :  { %787 = vmatprep.subr.bf16.mxu0 %v1572_v7  ;;  %v1693_v7 = vld [vmem:[#allocation7 + $0xc4] ss:$8 sps:$4 sm:$0xff]  }
  0x96   :  { %1076 = vmatpush1.bf16.msra.mxu1 %v1658_v30 }
  0x97   :  { %1077 = vmatprep.subr.bf16.mxu1 %v1663_v31 }
  0x98   :  { %788 = vmatpush1.bf16.msra.mxu0 %v1570_v10  ;;  %v94_v10 = vpack.c.bf16 %v87_v8, %v87_v8 }
  0x99   :  { %789 = vmatprep.subr.bf16.mxu0 %v1578_v11  ;;  %v1694_v11 = vld [vmem:[#allocation7 + $0xd0] ss:$8 sps:$4 sm:$0xff]  }
  0x9a   :  { %1078 = vmatpush1.bf16.msra.mxu1 %v1661_v34 }
  0x9b   :  { %1079 = vmatprep.subr.bf16.mxu1 %v1666_v35 }
  0x9c   :  { %790 = vmatpush1.bf16.msra.mxu0 %v1576_v14  ;;  %v1697_v14 = vld [vmem:[#allocation7 + $0xe0] ss:$8 sps:$4 sm:$0xff]  }
  0x9d   :  { %791 = vmatprep.subr.bf16.mxu0 %v1584_v15  ;;  %v1702_v15 = vld [vmem:[#allocation7 + $0xf4] ss:$8 sps:$4 sm:$0xff]  }
  0x9e   :  { %1080 = vmatpush1.bf16.msra.mxu1 %v1664_v38 }
  0x9f   :  { %1081 = vmatprep.subr.bf16.mxu1 %v1669_v39 }
  0xa0   :  { %792 = vmatpush1.bf16.msra.mxu0 %v1582_v18 }
  0xa1   :  { %793 = vmatprep.subr.bf16.mxu0 %v1590_v19 }
  0xa2   :  { %1082 = vmatpush1.bf16.msra.mxu1 %v1667_v42  ;;  %v1704_v42 = vld [vmem:[#allocation8] sm:$0xff]  }
  0xa3   :  { %1083 = vmatprep.subr.bf16.mxu1 %v1672_v43 }
  0xa4   :  { %794 = vmatpush1.bf16.msra.mxu0 %v1588_v22  ;;  %v195_v22 = vlaneseq }
  0xa5   :  { %795 = vmatprep.subr.bf16.mxu0 %v1596_v24 }
  0xa6   :  { %1084 = vmatpush1.bf16.msra.mxu1 %v1670_v46  ;;  %v196_v23 = vshrl.u32 %v195_v22, 7  ;;  %v1707_v46 = vld [vmem:[#allocation8 + $0x50] sm:$0xff]  }
  0xa7   :  { %1085 = vmatprep.subr.bf16.mxu1 %v1675_v47  ;;  %v1708_v47 = vld [vmem:[#allocation8 + $0x10] sm:$0xff]  }
  0xa8   :  { %796 = vmatpush1.bf16.msra.mxu0 %v1594_v28  ;;  %v197_v24 = vsub.s32 0, %v196_v23  ;;  %v201_v26 = vsub.s32 1, %v196_v23 }
  0xa9   :  { %797 = vmatprep.subr.bf16.mxu0 %v1602_v29 }
  0xaa   :  { %1086 = vmatpush1.bf16.msra.mxu1 %v1673_v50  ;;  %v198_v27 = vrot.slane %v193_v25, %v197_v24  ;;  %v202_v28 = vrot.slane %v193_v25, %v201_v26  ;;  %v1711_v50 = vld [vmem:[#allocation8 + $0x60] sm:$0xff]  }
  0xab   :  { %1087 = vmatprep.subr.bf16.mxu1 %v1678_v51  ;;  %v1712_v51 = vld [vmem:[#allocation8 + $0x20] sm:$0xff]  }
  0xac   :  { %798 = vmatpush1.bf16.msra.mxu0 %v1600_v32 }
  0xad   :  { %799 = vmatprep.subr.bf16.mxu0 %v1608_v33 }
  0xae   :  { %1088 = vmatpush1.bf16.msra.mxu1 %v1676_v54  ;;  %v1715_v54 = vld [vmem:[#allocation8 + $0x70] sm:$0xff]  }
  0xaf   :  { %1089 = vmatprep.subr.bf16.mxu1 %v1681_v55  ;;  %v1716_v55 = vld [vmem:[#allocation8 + $0x30] sm:$0xff]  }
  0xb0   :  { %800 = vmatpush1.bf16.msra.mxu0 %v1606_v36 }
  0xb1   :  { %801 = vmatprep.subr.bf16.mxu0 %v1614_v37 }
  0xb2   :  { %1090 = vmatpush1.bf16.msra.mxu1 %v1679_v58  ;;  %v901_v58 = vld [vmem:[%s1966_s4] sm:$0x3]  ;;  %s1846_s4 = smov [#allocation10]  }
  0xb3   :  { %1091 = vmatprep.subr.bf16.mxu1 %v1684_v59  ;;  %v906_v59 = vrot.slane %v901_v58, %v197_v24  ;;  %s1305_s30 = sshll.u32 %s1846_s4, 4  ;;  %s1306_s30 = int_to_ptr.vmem [resolvable:$true] %s1305_s30 }
  0xb4   :  { %802 = vmatpush1.bf16.msra.mxu0 %v1612_v40  ;;  %s1807_s8 = scalar_lea.vmem %s1306_s30, 64  ;;  %p1812_p5 = scmp.lt.s32.totalorder %s1306_s30, %s1306_s30 }
  0xb5   :  { %803 = vmatprep.subr.bf16.mxu0 %v1620_v41  ;;  %p1808_p4 = scmp.ne.s32.totalorder %s1306_s30, %s1807_s8  ;;  %p1813_p6 = scmp.lt.s32.totalorder %s1807_s8, %s1807_s8 }
  0xb6   :  { %1092 = vmatpush1.bf16.msra.mxu1 %v1682_v63 }
  0xb7   :  { %1093 = vmatprep.subr.bf16.mxu1 %v1687_v1  ;;  %p1814_p7 = por %p1813_p6, %p1812_p5 }
  0xb8   :  { %804 = vmatpush1.bf16.msra.mxu0 %v1618_v44  ;;  %v1705_v44 = vld [vmem:[#allocation8 + $0x48] sm:$0xff]  }
  0xb9   :  { %805 = vmatprep.subr.bf16.mxu0 %v1626_v45  ;;  %v1706_v45 = vld [vmem:[#allocation8 + $0x8] sm:$0xff]   ;;  %p1815_p8 = pnand %p1814_p7, %p1808_p4 }
  0xba   :  { %1094 = vmatpush1.bf16.msra.mxu1 %v1685_v3 }
  0xbb   :  { %1095 = vmatprep.subr.bf16.mxu1 %v1690_v4 }
  0xbc   :  { %806 = vmatpush1.bf16.msra.mxu0 %v1624_v48  ;;  %v1709_v48 = vld [vmem:[#allocation8 + $0x58] sm:$0xff]  }
  0xbd   :  { %807 = vmatprep.subr.bf16.mxu0 %v1632_v49  ;;  %v1710_v49 = vld [vmem:[#allocation8 + $0x18] sm:$0xff]  }
  0xbe   :  { %1096 = vmatpush1.bf16.msra.mxu1 %v1688_v6 }
  0xbf   :  { %1097 = vmatprep.subr.bf16.mxu1 %v1693_v7 }
  0xc0   :  { %808 = vmatpush1.bf16.msra.mxu0 %v1630_v52  ;;  %v1713_v52 = vld [vmem:[#allocation8 + $0x68] sm:$0xff]  }
  0xc1   :  { %809 = vmatprep.subr.bf16.mxu0 %v1638_v53  ;;  %v1714_v53 = vld [vmem:[#allocation8 + $0x28] sm:$0xff]  }
  0xc2   :  { %1098 = vmatpush1.bf16.msra.mxu1 %v1691_v9 }
  0xc3   :  { %1099 = vmatprep.subr.bf16.mxu1 %v1696_v12 }
  0xc4   :  { %810 = vmatpush1.bf16.msra.mxu0 %v1636_v56  ;;  %v1717_v56 = vld [vmem:[#allocation8 + $0x78] sm:$0xff]  }
  0xc5   :  { %811 = vmatprep.subr.bf16.mxu0 %v1644_v57  ;;  %v1718_v57 = vld [vmem:[#allocation8 + $0x38] sm:$0xff]  }
  0xc6   :  { %1100 = vmatpush1.bf16.msra.mxu1 %v1694_v11 }
  0xc7   :  { %1101 = vmatprep.subr.bf16.mxu1 %v1699_v13 }
  0xc8   :  { %812 = vmatpush1.bf16.msra.mxu0 %v1642_v60  ;;  %v910_v60 = vrot.slane %v901_v58, %v201_v26 }
  0xc9   :  { %822 = vmatprep.subr.bf16.mxu0 %v1650_v62 }
  0xca   :  { %1102 = vmatpush1.bf16.msra.mxu1 %v1697_v14 }
  0xcb   :  { %814 = vmatmul.mubr.bf16.vlgmr.msra.gmra.mrb[0].mxu0 %v92_v0  ;;  %1103 = vmatprep.subr.bf16.mxu1 %v1702_v15 }
  0xcc   :  { %823 = vmatpush1.bf16.msra.mxu0 %v1648_v2  ;;  %854 = vmatprep.mubr.bf16.mxu0 %v1845_v5 }
  0xce   :  { %1104 = vmatpush1.bf16.msra.mxu1 %v1700_v16 }
  0xcf   :  { %1464 = vmatprep.subr.bf16.mxu1 %v1703_v17 }
  0xd7   :  { %1414 = vmatmul.mubr.msk.bf16.vlgmr.msra.gmra.mrb[0].mxu0 %vm695_vm0, %v94_v10  ;;  %v1447_v10 = vld [vmem:[%s1968_s6] ss:$0 sm:$0xff] }
 0x164   :  { %v733_v18 = vpop.f32.mrb[0].mxu1 }
 0x165   :  { %v735_v19 = vpop.f32.mrb[1].mxu1  ;;  %v734_v29 = vadd.f32 %v733_v18, %v198_v27 }
 0x166   :  { %v737_v20 = vpop.f32.mrb[2].mxu1  ;;  %v736_v30 = vadd.f32 %v735_v19, %v202_v28 }
 0x167   :  { %v738_v21 = vpop.f32.mrb[3].mxu1 }
 0x1aa   :  { %v856_v31 = vpop.f32.mrb[0].mxu0 }
 0x1ab   :  { %v1487_v32 = vadd.f32 %v856_v31, %v734_v29  ;;  %v858_v33 = vpop.f32.mrb[1].mxu0 }
 0x1ac   :  { %v1489_v34 = vadd.f32 %v858_v33, %v736_v30  ;;  %v860_v35 = vpop.f32.mrb[2].mxu0 }
 0x1ad   :  { %v863_v36 = vmul.f32 0.01, %v1487_v32  ;;  %v861_v37 = vpop.f32.mrb[3].mxu0 }
 0x1ae   :  { %v864_v38 = vmul.f32 0.01, %v1489_v34 }
 0x1af   :  { %v865_v39 = vmax.f32 %v1487_v32, %v863_v36 }
 0x1b0   :  { %v866_v40 = vmax.f32 %v1489_v34, %v864_v38 }
 0x1b1   :  { %v867_v43 = vpack.c.bf16 %v865_v39, %v865_v39 }
 0x1b2   :  { %v868_v41 = vpack.c.bf16 %v866_v40, %v866_v40 }
 0x1b4   :  { %1105 = vmatprep.mubr.bf16.mxu1 %v868_v41 }
 0x1b5   :  { %1106 = vmatmul.mubr.bf16.vlgmr.msra.gmra.mrb[4].mxu1 %v867_v43 }
 0x1b6   :  { %1465 = vmatpush3.bf16.msra.mxu1 %v1704_v42 }
 0x1b7   :  { %1466 = vmatprep.subr.bf16.mxu1 %v1705_v44 }
 0x1ba   :  { %1467 = vmatpush3.bf16.msra.mxu1 %v1706_v45 }
 0x1bb   :  { %1468 = vmatprep.subr.bf16.mxu1 %v1707_v46 }
 0x1be   :  { %1469 = vmatpush3.bf16.msra.mxu1 %v1708_v47 }
 0x1bf   :  { %1470 = vmatprep.subr.bf16.mxu1 %v1709_v48 }
 0x1c2   :  { %1471 = vmatpush3.bf16.msra.mxu1 %v1710_v49 }
 0x1c3   :  { %1472 = vmatprep.subr.bf16.mxu1 %v1711_v50 }
 0x1c6   :  { %1473 = vmatpush3.bf16.msra.mxu1 %v1712_v51 }
 0x1c7   :  { %1474 = vmatprep.subr.bf16.mxu1 %v1713_v52 }
 0x1ca   :  { %1475 = vmatpush3.bf16.msra.mxu1 %v1714_v53 }
 0x1cb   :  { %1476 = vmatprep.subr.bf16.mxu1 %v1715_v54 }
 0x1ce   :  { %1477 = vmatpush3.bf16.msra.mxu1 %v1716_v55 }
 0x1cf   :  { %1478 = vmatprep.subr.bf16.mxu1 %v1717_v56 }
 0x1d2   :  { %1479 = vmatpush3.bf16.msra.mxu1 %v1718_v57 }
 0x288   :  { %v1107_v61 = vpop.f32.mrb[4].mxu1 }
 0x289   :  { %v1108_v62 = vadd.f32 %v1107_v61, %v906_v59  ;;  %v1109_v63 = vpop.f32.mrb[5].mxu1 }
 0x28a   :  { %v1110_v0 = vadd.f32 %v1109_v63, %v910_v60  ;;  %v1111_v1 = vpop.f32.mrb[6].mxu1 }
 0x28b   :  { %v1114_v2 = vmul.f32 0.01, %v1108_v62  ;;  %v1112_v3 = vpop.f32.mrb[7].mxu1 }
 0x28c   :  { %v1115_v4 = vmul.f32 0.01, %v1110_v0 }
 0x28d   :  { %v1116_v5 = vmax.f32 %v1108_v62, %v1114_v2 }
 0x28e   :  { %v1117_v6 = vmax.f32 %v1110_v0, %v1115_v4 }
 0x28f   :  { %v1118_v8 = vpack.c.bf16 %v1116_v5, %v1116_v5 }
 0x290   :  { %v1119_v7 = vpack.c.bf16 %v1117_v6, %v1117_v6 }
 0x292   :  { %1287 = vmatprep.mubr.bf16.mxu1 %v1119_v7 }
 0x293   :  { %1288 = vmatmul.mubr.bf16.vlgmr.msra.gmra.mrb[8].mxu1 %v1118_v8 }
 0x366   :  { %v1480_v9 = vpop.f32.mrb[8].mxu1 }
 0x367   :  { %v1481_v11 = vpop.f32.mrb[9].mxu1 }
 0x368   :  { %v1482_v12 = vadd.f32 %v1481_v11, %v1480_v9  ;;  %v1483_v13 = vpop.f32.mrb[10].mxu1 }
 0x369   :  { %v1484_v14 = vpop.f32.mrb[11].mxu1 }
 0x36a   :  { %v1290_v15 = vadd.f32 %v1482_v12, %v1447_v10 }
 0x36c   :  { %v1295_v16 = vmul.f32 0.01, %v1290_v15 }
 0x36e   :  { %v1296_v17 = vmax.f32 %v1290_v15, %v1295_v16 }
 0x370   :  { %v1297_v18 = vpack.c.bf16 %v1296_v17, %v1296_v17 }
 0x372   :  { %1298 = vst [vmem:[#allocation10] sm:$0xf] %v1297_v18 }
 0x373   :  { %1818 = shalt.err (!%p1815_p8)
}
 0x374   :  { %s1819_s10 = scalar_lea.hbm %s1969_s7, 64 }
 0x375   :  { %p1820_p9 = scmp.ne.s32.totalorder %s1969_s7, %s1819_s10  ;;  %p1823_p10 = scmp.lt.u32.totalorder %s1819_s10, %s1969_s7 }
 0x377   :  { %p1825_p11 = pnand %p1823_p10, %p1820_p9 }
 0x379   :  { %1828 = shalt.err (!%p1825_p11)
}
 0x37a   :  { %1308 = dma.vmem_to_hbm [thread:$0]  %s1306_s30, 64, %s1969_s7, [#allocation4]  }
 0x37b   :  { %1835 = dma.done.wait [#allocation4], 64  }
 0x37c   :  { %1836 = vsyncadd [#allocation4], 4294967232 }
 0x37d   :  { %1312 = vsyncpa [#allocation3], 1 }
 0x37e   :  { %1313 = vsyncpa [#allocation6], 1 }
 0x37f   :  { %1314 = vsyncpa [#allocation9], 1 }
 0x380   :  { %1315 = vsyncpa [#allocation4], 1 }

</bundles_post_ra>
